<compile_context>
chip_gen: v7x
topology: tpu7x:2x2x1
jax: 0.10.0
libtpu: 0.0.40
codegen_flags: <defaults>
</compile_context>

<pallas_src>
import functools

import numpy as np

import jax
import jax.numpy as jnp
from jax.experimental import pallas as pl
from jax.experimental.pallas import tpu as pltpu


def _round_up(x, m):
    return ((x + m - 1) // m) * m


# ----------------------------------------------------------------------------
# Pallas kernel 1: transposed patch-conv matmul  O = relu(W @ X + b)
#   W: (Cout, K) bf16 (resident)   X: (K, TM) bf16 (streamed over M)
#   b: (Cout, 1) f32 (resident)    O: (Cout, TM) bf16 (lane-dense: TM on lanes)
# ----------------------------------------------------------------------------
def _conv_matmul_kernel(w_ref, x_ref, b_ref, o_ref):
    acc = jnp.dot(w_ref[...], x_ref[...], preferred_element_type=jnp.float32)
    acc = acc + b_ref[...]                       # (Cout,1) broadcast over lanes
    o_ref[...] = jnp.maximum(acc, 0.0).astype(o_ref.dtype)


def conv_matmul_bias_relu(w_nk, x_km, b_n1, *, max_tm=2048, out_dtype=jnp.bfloat16):
    """relu(W @ X + b) with M tiled on a parallel grid axis (lane axis).

    M is padded up to a multiple of a 128-aligned tile TM (no single-tile
    fallback), so stores are always unmasked and VMEM use is bounded on every
    TPU generation.  TM is capped at align128(ceil(M/2)) so both v7x cores get
    at least one tile whenever M >= 256.
    """
    N, K = w_nk.shape
    K2, M = x_km.shape
    assert K == K2
    TM = max(128, min(max_tm, _round_up(pl.cdiv(M, 2), 128)))
    M_pad = _round_up(M, TM)
    if M_pad != M:
        x_km = jnp.pad(x_km, ((0, 0), (0, M_pad - M)))
    grid = (M_pad // TM,)

    out_bytes = jnp.dtype(out_dtype).itemsize
    cost = pl.CostEstimate(
        flops=2 * N * K * M_pad,
        transcendentals=0,
        bytes_accessed=(N * K * 2) + (K * M_pad * 2) + (N * 4) + (N * M_pad * out_bytes),
    )

    y = pl.pallas_call(
        _conv_matmul_kernel,
        out_shape=jax.ShapeDtypeStruct((N, M_pad), out_dtype),
        grid=grid,
        in_specs=[
            pl.BlockSpec((N, K), lambda i: (0, 0)),   # resident weights
            pl.BlockSpec((K, TM), lambda i: (0, i)),  # activations streamed over M
            pl.BlockSpec((N, 1), lambda i: (0, 0)),   # resident bias
        ],
        out_specs=pl.BlockSpec((N, TM), lambda i: (0, i)),   # lane-dense store
        compiler_params=pltpu.CompilerParams(
            dimension_semantics=("parallel",),        # split M tiles across TCs
            vmem_limit_bytes=32 * 1024 * 1024,        # headroom under v7x 64 MiB
        ),
        cost_estimate=cost,
    )(w_nk, x_km, b_n1)
    return y[:, :M] if M_pad != M else y


# ----------------------------------------------------------------------------
# Pallas kernel 2: nearest-neighbour mask resize for ALL resolutions, one call.
#   Per batch element b:  out_r[b] = Sh_r @ (mask[b] @ SwT_r)
#   with exact 0/1 selection matrices (PyTorch 'nearest': src = floor(dst*in/out))
# ----------------------------------------------------------------------------
def _make_mask_resize_kernel(n_res):
    def kernel(*refs):
        m_ref = refs[0]
        sel_refs = refs[1:1 + 2 * n_res]
        out_refs = refs[1 + 2 * n_res:]
        m = m_ref[...].astype(jnp.float32)                  # (H, W)
        for r in range(n_res):
            sh = sel_refs[2 * r][...].astype(jnp.float32)   # (Hf, H)
            swt = sel_refs[2 * r + 1][...].astype(jnp.float32)  # (W, Wf)
            cols = jnp.dot(m, swt, preferred_element_type=jnp.float32)
            rows = jnp.dot(sh, cols, preferred_element_type=jnp.float32)
            out_refs[r][...] = rows.astype(out_refs[r].dtype)
    return kernel


@functools.lru_cache(maxsize=None)
def _nearest_selection_mats(H, W, Hf, Wf):
    """Cached host-built 0/1 selection matrices (per batch element, bf16)."""
    src_h = np.floor(np.arange(Hf) * (H / Hf)).astype(np.int64)
    sh = np.zeros((Hf, H), np.float32)
    sh[np.arange(Hf), src_h] = 1.0                           # (Hf, H)
    src_w = np.floor(np.arange(Wf) * (W / Wf)).astype(np.int64)
    swt = np.zeros((W, Wf), np.float32)
    swt[src_w, np.arange(Wf)] = 1.0                          # (W, Wf)
    return jnp.asarray(sh, jnp.bfloat16), jnp.asarray(swt, jnp.bfloat16)


def mask_nearest_resize_multi(mask_bool, out_hws):
    """Resize a (B,H,W) bool mask to every (Hf,Wf) in out_hws. One launch."""
    B, H, W = mask_bool.shape
    n = len(out_hws)
    mats = []
    for (Hf, Wf) in out_hws:
        sh, swt = _nearest_selection_mats(H, W, int(Hf), int(Wf))
        mats += [sh, swt]
    m3 = mask_bool.astype(jnp.bfloat16)                      # (B, H, W) 0/1 exact

    in_specs = [pl.BlockSpec((None, H, W), lambda b: (b, 0, 0))]   # one batch row/step
    for a in mats:
        in_specs.append(pl.BlockSpec(a.shape, lambda b: (0, 0)))   # resident sel. mats
    out_shapes = tuple(
        jax.ShapeDtypeStruct((B, Hf, Wf), jnp.float32) for (Hf, Wf) in out_hws)
    out_specs = tuple(
        pl.BlockSpec((None, Hf, Wf), lambda b: (b, 0, 0)) for (Hf, Wf) in out_hws)

    outs = pl.pallas_call(
        _make_mask_resize_kernel(n),
        out_shape=out_shapes,
        grid=(B,),
        in_specs=in_specs,
        out_specs=out_specs,
        compiler_params=pltpu.CompilerParams(
            dimension_semantics=("parallel",),
            vmem_limit_bytes=32 * 1024 * 1024,
        ),
    )(m3, *mats)
    return tuple(o.astype(jnp.bool_) for o in outs)


# ----------------------------------------------------------------------------
# Glue: patchify a (C, B, H, W) bf16 activation for a k x k / stride-k conv
#   -> (K, M) with K ordered (Cin, kh, kw) and M ordered (B, Ho, Wo)
# ----------------------------------------------------------------------------
def _patchify_cbhw(x_cbhw, k):
    C, B, H, W = x_cbhw.shape
    Ho, Wo = H // k, W // k
    p = x_cbhw.reshape(C, B, Ho, k, Wo, k)
    p = jnp.transpose(p, (0, 3, 5, 1, 2, 4))          # (C, kh, kw, B, Ho, Wo)
    return p.reshape(C * k * k, B * Ho * Wo), (B, Ho, Wo)


# ----------------------------------------------------------------------------
# BackboneBase equivalent
# ----------------------------------------------------------------------------
class BackboneBase:
    """JAX/Pallas re-implementation of BackboneBase.forward.

    Synthetic ResNet-like body (channels scaled down vs. [512,1024,2048]):
      layer1: stride-4 patch conv, C=8
      layer2: stride-2 patch conv, C=16   (total stride 8)
      layer3: stride-2 patch conv, C=32   (total stride 16)
      layer4: stride-2 patch conv, C=64   (total stride 32)
    """

    def __init__(self, key, in_channels=3, return_interm_layers=True):
        # TODO(synk): parameter freezing (requires_grad_) is training-only; no forward effect.
        self.return_interm_layers = return_interm_layers
        if return_interm_layers:
            self.return_layers = {"layer2": "0", "layer3": "1", "layer4": "2"}
            self.strides = [8, 16, 32]
            self.num_channels = [16, 32, 64]   # scaled stand-ins for [512, 1024, 2048]
        else:
            self.return_layers = {"layer4": "0"}
            self.strides = [32]
            self.num_channels = [64]

        # (name, Cin, Cout, stride)
        self.layer_defs = [
            ("layer1", in_channels, 8, 4),
            ("layer2", 8, 16, 2),
            ("layer3", 16, 32, 2),
            ("layer4", 32, 64, 2),
        ]
        self.params = {}
        for name, cin, cout, s in self.layer_defs:
            key, wk, bk = jax.random.split(key, 3)
            fan_in = cin * s * s
            w = jax.random.normal(wk, (cout, cin, s, s), jnp.float32) / jnp.sqrt(fan_in)
            b = 0.01 * jax.random.normal(bk, (cout,), jnp.float32)
            self.params[name] = (w, b)

        self._forward = jax.jit(self._forward_impl)

    def _forward_impl(self, tensors, mask):
        # tensors: (B, C, H, W) float32 [NCHW]; mask: (B, H, W) bool
        # Carry activations in (C, B, H, W) layout and bf16: the kernel's
        # transposed bf16 output (Cout, B*Ho*Wo) reshapes into it for free;
        # NCHW + f32 only for the final returned feature maps.
        h = jnp.transpose(tensors, (1, 0, 2, 3)).astype(jnp.bfloat16)   # (C,B,H,W) bf16
        feats = {}
        for name, cin, cout, k in self.layer_defs:
            w4, b = self.params[name]
            w_nk = w4.reshape(cout, cin * k * k).astype(jnp.bfloat16)
            b_n1 = b.reshape(cout, 1)
            patches, (B_, Ho, Wo) = _patchify_cbhw(h, k)        # (K, M) bf16
            y = conv_matmul_bias_relu(w_nk, patches, b_n1, out_dtype=jnp.bfloat16)
            h = y.reshape(cout, B_, Ho, Wo)                     # bf16 carried layout
            if name in self.return_layers:
                feats[self.return_layers[name]] = h

        names = list(feats.keys())
        sizes = tuple((int(feats[n].shape[2]), int(feats[n].shape[3])) for n in names)
        masks = mask_nearest_resize_multi(mask, sizes)           # single Pallas launch

        out = {}
        for n, m in zip(names, masks):
            feat_nchw = jnp.transpose(feats[n], (1, 0, 2, 3)).astype(jnp.float32)
            out[n] = (feat_nchw, m)                              # NestedTensor(x, mask)
        return out

    def __call__(self, tensors, mask):
        return self._forward(tensors, mask)


# ----------------------------------------------------------------------------
if __name__ == "__main__":
    key = jax.random.PRNGKey(0)
    k_model, k_x, k_m = jax.random.split(key, 3)

    B, C, H, W = 2, 3, 64, 64
    x = jax.random.normal(k_x, (B, C, H, W), jnp.float32)
    mask = jax.random.bernoulli(k_m, 0.3, (B, H, W))

    backbone = BackboneBase(k_model, in_channels=C, return_interm_layers=True)
    out = backbone(x, mask)
    out = jax.block_until_ready(out)

    # Pure-JAX reference with matching bf16 operand rounding (f32 accumulation).
    def ref_forward(x_nchw):
        feats = {}
        h = x_nchw
        for name, cin, cout, s in backbone.layer_defs:
            w, b = backbone.params[name]
            hb = h.astype(jnp.bfloat16).astype(jnp.float32)
            wb = w.astype(jnp.bfloat16).astype(jnp.float32)
            y = jax.lax.conv_general_dilated(
                hb, wb, window_strides=(s, s), padding="VALID",
                dimension_numbers=("NCHW", "OIHW", "NCHW"))
            h = jnp.maximum(y + b[None, :, None, None], 0.0)
            if name in backbone.return_layers:
                feats[backbone.return_layers[name]] = h
        return feats

    refs = jax.block_until_ready(ref_forward(x))

    expected = {"0": (16, 8), "1": (32, 16), "2": (64, 32)}
    for name, (feat, m) in out.items():
        c_exp, stride = expected[name]
        assert feat.shape == (B, c_exp, H // stride, W // stride), feat.shape
        assert feat.dtype == jnp.float32
        assert m.shape == (B, H // stride, W // stride), m.shape
        assert m.dtype == jnp.bool_
        # nearest-resize correctness vs. direct strided slice (integer ratio)
        ref_m = mask[:, ::stride, ::stride]
        assert bool(jnp.all(m == ref_m))
        # conv+bias+relu numerical check vs. XLA reference (bf16-carried activations)
        max_diff = float(jnp.max(jnp.abs(feat - refs[name])))
        assert jnp.allclose(feat, refs[name], atol=5e-2, rtol=5e-2), (name, max_diff)

    print("KERNEL_OK")
</pallas_src>

<mosaic_0001>
module attributes {stable_mosaic.version = 11 : i64} {
  func.func @_conv_matmul_kernel(%arg0: i32, %arg1: memref<8x48xbf16, #tpu.memory_space<vmem>>, %arg2: memref<48x256xbf16, #tpu.memory_space<vmem>>, %arg3: memref<8x1xf32, #tpu.memory_space<vmem>>, %arg4: memref<8x256xbf16, #tpu.memory_space<vmem>>) attributes {dimension_semantics = [#tpu.dimension_semantics<parallel>], iteration_bounds = array<i64: 2>, scalar_prefetch = 0 : i64, scratch_operands = 0 : i64, tpu.core_type = #tpu.core_type<tc>, window_params = [{pipeline_mode = #tpu.pipeline_mode<synchronous>, transform_indices = @transform_0, window_bounds = array<i64: 8, 48>}, {transform_indices = @transform_1, window_bounds = array<i64: 48, 256>}, {pipeline_mode = #tpu.pipeline_mode<synchronous>, transform_indices = @transform_2, window_bounds = array<i64: 8, 1>}, {transform_indices = @transform_3, window_bounds = array<i64: 8, 256>}]} {
    %c0 = arith.constant 0 : index
    %c0_0 = arith.constant 0 : index
    %0 = vector.load %arg1[%c0, %c0_0] : memref<8x48xbf16, #tpu.memory_space<vmem>>, vector<8x48xbf16>
    %c0_1 = arith.constant 0 : index
    %c0_2 = arith.constant 0 : index
    %1 = vector.load %arg2[%c0_1, %c0_2] : memref<48x256xbf16, #tpu.memory_space<vmem>>, vector<48x256xbf16>
    %cst = arith.constant dense<0.000000e+00> : vector<8x256xf32>
    %2 = tpu.matmul %0, %1, %cst {dimension_numbers = #tpu.dot_dimension_numbers<[1], [0], [0], [1], [0, 0, 1, 1], [], []>} : vector<8x48xbf16>, vector<48x256xbf16>, vector<8x256xf32> -> vector<8x256xf32>
    %c0_3 = arith.constant 0 : index
    %c0_4 = arith.constant 0 : index
    %3 = vector.load %arg3[%c0_3, %c0_4] : memref<8x1xf32, #tpu.memory_space<vmem>>, vector<8x1xf32>
    %4 = vector.broadcast %3 : vector<8x1xf32> to vector<8x256xf32>
    %5 = arith.addf %2, %4 : vector<8x256xf32>
    %cst_5 = arith.constant 0.000000e+00 : f32
    %6 = vector.broadcast %cst_5 : f32 to vector<8x256xf32>
    %7 = arith.maximumf %5, %6 : vector<8x256xf32>
    %8 = arith.truncf %7 : vector<8x256xf32> to vector<8x256xbf16>
    %c0_6 = arith.constant 0 : index
    %c0_7 = arith.constant 0 : index
    %9 = vector.load %arg4[%c0_6, %c0_7] : memref<8x256xbf16, #tpu.memory_space<vmem>>, vector<8x256xbf16>
    tpu.vector_store %arg4[%c0_6, %c0_7], %8 {strides = array<i32>} : memref<8x256xbf16, #tpu.memory_space<vmem>>, vector<8x256xbf16>,
    return
  }
  func.func @transform_0(%arg0: i32) -> (i32, i32) {
    %c0_i32 = arith.constant 0 : i32
    %c0_i32_0 = arith.constant 0 : i32
    %c0_i32_1 = arith.constant 0 : i32
    return %c0_i32, %c0_i32_0 : i32, i32
  }
  func.func @transform_1(%arg0: i32) -> (i32, i32) {
    %c0_i32 = arith.constant 0 : i32
    %c0_i32_0 = arith.constant 0 : i32
    return %c0_i32, %arg0 : i32, i32
  }
  func.func @transform_2(%arg0: i32) -> (i32, i32) {
    %c0_i32 = arith.constant 0 : i32
    %c0_i32_0 = arith.constant 0 : i32
    %c0_i32_1 = arith.constant 0 : i32
    return %c0_i32, %c0_i32_0 : i32, i32
  }
  func.func @transform_3(%arg0: i32) -> (i32, i32) {
    %c0_i32 = arith.constant 0 : i32
    %c0_i32_0 = arith.constant 0 : i32
    return %c0_i32, %arg0 : i32, i32
  }
}

module attributes {stable_mosaic.version = 11 : i64} {
  func.func @_conv_matmul_kernel(%arg0: i32, %arg1: memref<16x32xbf16, #tpu.memory_space<vmem>>, %arg2: memref<32x128xbf16, #tpu.memory_space<vmem>>, %arg3: memref<16x1xf32, #tpu.memory_space<vmem>>, %arg4: memref<16x128xbf16, #tpu.memory_space<vmem>>) attributes {dimension_semantics = [#tpu.dimension_semantics<parallel>], iteration_bounds = array<i64: 1>, scalar_prefetch = 0 : i64, scratch_operands = 0 : i64, tpu.core_type = #tpu.core_type<tc>, window_params = [{pipeline_mode = #tpu.pipeline_mode<synchronous>, transform_indices = @transform_0, window_bounds = array<i64: 16, 32>}, {transform_indices = @transform_1, window_bounds = array<i64: 32, 128>}, {pipeline_mode = #tpu.pipeline_mode<synchronous>, transform_indices = @transform_2, window_bounds = array<i64: 16, 1>}, {transform_indices = @transform_3, window_bounds = array<i64: 16, 128>}]} {
    %c0 = arith.constant 0 : index
    %c0_0 = arith.constant 0 : index
    %0 = vector.load %arg1[%c0, %c0_0] : memref<16x32xbf16, #tpu.memory_space<vmem>>, vector<16x32xbf16>
    %c0_1 = arith.constant 0 : index
    %c0_2 = arith.constant 0 : index
    %1 = vector.load %arg2[%c0_1, %c0_2] : memref<32x128xbf16, #tpu.memory_space<vmem>>, vector<32x128xbf16>
    %cst = arith.constant dense<0.000000e+00> : vector<16x128xf32>
    %2 = tpu.matmul %0, %1, %cst {dimension_numbers = #tpu.dot_dimension_numbers<[1], [0], [0], [1], [0, 0, 1, 1], [], []>} : vector<16x32xbf16>, vector<32x128xbf16>, vector<16x128xf32> -> vector<16x128xf32>
    %c0_3 = arith.constant 0 : index
    %c0_4 = arith.constant 0 : index
    %3 = vector.load %arg3[%c0_3, %c0_4] : memref<16x1xf32, #tpu.memory_space<vmem>>, vector<16x1xf32>
    %4 = vector.broadcast %3 : vector<16x1xf32> to vector<16x128xf32>
    %5 = arith.addf %2, %4 : vector<16x128xf32>
    %cst_5 = arith.constant 0.000000e+00 : f32
    %6 = vector.broadcast %cst_5 : f32 to vector<16x128xf32>
    %7 = arith.maximumf %5, %6 : vector<16x128xf32>
    %8 = arith.truncf %7 : vector<16x128xf32> to vector<16x128xbf16>
    %c0_6 = arith.constant 0 : index
    %c0_7 = arith.constant 0 : index
    %9 = vector.load %arg4[%c0_6, %c0_7] : memref<16x128xbf16, #tpu.memory_space<vmem>>, vector<16x128xbf16>
    tpu.vector_store %arg4[%c0_6, %c0_7], %8 {strides = array<i32>} : memref<16x128xbf16, #tpu.memory_space<vmem>>, vector<16x128xbf16>,
    return
  }
  func.func @transform_0(%arg0: i32) -> (i32, i32) {
    %c0_i32 = arith.constant 0 : i32
    %c0_i32_0 = arith.constant 0 : i32
    %c0_i32_1 = arith.constant 0 : i32
    return %c0_i32, %c0_i32_0 : i32, i32
  }
  func.func @transform_1(%arg0: i32) -> (i32, i32) {
    %c0_i32 = arith.constant 0 : i32
    %c0_i32_0 = arith.constant 0 : i32
    return %c0_i32, %arg0 : i32, i32
  }
  func.func @transform_2(%arg0: i32) -> (i32, i32) {
    %c0_i32 = arith.constant 0 : i32
    %c0_i32_0 = arith.constant 0 : i32
    %c0_i32_1 = arith.constant 0 : i32
    return %c0_i32, %c0_i32_0 : i32, i32
  }
  func.func @transform_3(%arg0: i32) -> (i32, i32) {
    %c0_i32 = arith.constant 0 : i32
    %c0_i32_0 = arith.constant 0 : i32
    return %c0_i32, %arg0 : i32, i32
  }
}

module attributes {stable_mosaic.version = 11 : i64} {
  func.func @_conv_matmul_kernel(%arg0: i32, %arg1: memref<32x64xbf16, #tpu.memory_space<vmem>>, %arg2: memref<64x128xbf16, #tpu.memory_space<vmem>>, %arg3: memref<32x1xf32, #tpu.memory_space<vmem>>, %arg4: memref<32x128xbf16, #tpu.memory_space<vmem>>) attributes {dimension_semantics = [#tpu.dimension_semantics<parallel>], iteration_bounds = array<i64: 1>, scalar_prefetch = 0 : i64, scratch_operands = 0 : i64, tpu.core_type = #tpu.core_type<tc>, window_params = [{pipeline_mode = #tpu.pipeline_mode<synchronous>, transform_indices = @transform_0, window_bounds = array<i64: 32, 64>}, {transform_indices = @transform_1, window_bounds = array<i64: 64, 128>}, {pipeline_mode = #tpu.pipeline_mode<synchronous>, transform_indices = @transform_2, window_bounds = array<i64: 32, 1>}, {transform_indices = @transform_3, window_bounds = array<i64: 32, 128>}]} {
    %c0 = arith.constant 0 : index
    %c0_0 = arith.constant 0 : index
    %0 = vector.load %arg1[%c0, %c0_0] : memref<32x64xbf16, #tpu.memory_space<vmem>>, vector<32x64xbf16>
    %c0_1 = arith.constant 0 : index
    %c0_2 = arith.constant 0 : index
    %1 = vector.load %arg2[%c0_1, %c0_2] : memref<64x128xbf16, #tpu.memory_space<vmem>>, vector<64x128xbf16>
    %cst = arith.constant dense<0.000000e+00> : vector<32x128xf32>
    %2 = tpu.matmul %0, %1, %cst {dimension_numbers = #tpu.dot_dimension_numbers<[1], [0], [0], [1], [0, 0, 1, 1], [], []>} : vector<32x64xbf16>, vector<64x128xbf16>, vector<32x128xf32> -> vector<32x128xf32>
    %c0_3 = arith.constant 0 : index
    %c0_4 = arith.constant 0 : index
    %3 = vector.load %arg3[%c0_3, %c0_4] : memref<32x1xf32, #tpu.memory_space<vmem>>, vector<32x1xf32>
    %4 = vector.broadcast %3 : vector<32x1xf32> to vector<32x128xf32>
    %5 = arith.addf %2, %4 : vector<32x128xf32>
    %cst_5 = arith.constant 0.000000e+00 : f32
    %6 = vector.broadcast %cst_5 : f32 to vector<32x128xf32>
    %7 = arith.maximumf %5, %6 : vector<32x128xf32>
    %8 = arith.truncf %7 : vector<32x128xf32> to vector<32x128xbf16>
    %c0_6 = arith.constant 0 : index
    %c0_7 = arith.constant 0 : index
    %9 = vector.load %arg4[%c0_6, %c0_7] : memref<32x128xbf16, #tpu.memory_space<vmem>>, vector<32x128xbf16>
    tpu.vector_store %arg4[%c0_6, %c0_7], %8 {strides = array<i32>} : memref<32x128xbf16, #tpu.memory_space<vmem>>, vector<32x128xbf16>,
    return
  }
  func.func @transform_0(%arg0: i32) -> (i32, i32) {
    %c0_i32 = arith.constant 0 : i32
    %c0_i32_0 = arith.constant 0 : i32
    %c0_i32_1 = arith.constant 0 : i32
    return %c0_i32, %c0_i32_0 : i32, i32
  }
  func.func @transform_1(%arg0: i32) -> (i32, i32) {
    %c0_i32 = arith.constant 0 : i32
    %c0_i32_0 = arith.constant 0 : i32
    return %c0_i32, %arg0 : i32, i32
  }
  func.func @transform_2(%arg0: i32) -> (i32, i32) {
    %c0_i32 = arith.constant 0 : i32
    %c0_i32_0 = arith.constant 0 : i32
    %c0_i32_1 = arith.constant 0 : i32
    return %c0_i32, %c0_i32_0 : i32, i32
  }
  func.func @transform_3(%arg0: i32) -> (i32, i32) {
    %c0_i32 = arith.constant 0 : i32
    %c0_i32_0 = arith.constant 0 : i32
    return %c0_i32, %arg0 : i32, i32
  }
}

module attributes {stable_mosaic.version = 11 : i64} {
  func.func @_conv_matmul_kernel(%arg0: i32, %arg1: memref<64x128xbf16, #tpu.memory_space<vmem>>, %arg2: memref<128x128xbf16, #tpu.memory_space<vmem>>, %arg3: memref<64x1xf32, #tpu.memory_space<vmem>>, %arg4: memref<64x128xbf16, #tpu.memory_space<vmem>>) attributes {dimension_semantics = [#tpu.dimension_semantics<parallel>], iteration_bounds = array<i64: 1>, scalar_prefetch = 0 : i64, scratch_operands = 0 : i64, tpu.core_type = #tpu.core_type<tc>, window_params = [{pipeline_mode = #tpu.pipeline_mode<synchronous>, transform_indices = @transform_0, window_bounds = array<i64: 64, 128>}, {transform_indices = @transform_1, window_bounds = array<i64: 128, 128>}, {pipeline_mode = #tpu.pipeline_mode<synchronous>, transform_indices = @transform_2, window_bounds = array<i64: 64, 1>}, {transform_indices = @transform_3, window_bounds = array<i64: 64, 128>}]} {
    %c0 = arith.constant 0 : index
    %c0_0 = arith.constant 0 : index
    %0 = vector.load %arg1[%c0, %c0_0] : memref<64x128xbf16, #tpu.memory_space<vmem>>, vector<64x128xbf16>
    %c0_1 = arith.constant 0 : index
    %c0_2 = arith.constant 0 : index
    %1 = vector.load %arg2[%c0_1, %c0_2] : memref<128x128xbf16, #tpu.memory_space<vmem>>, vector<128x128xbf16>
    %cst = arith.constant dense<0.000000e+00> : vector<64x128xf32>
    %2 = tpu.matmul %0, %1, %cst {dimension_numbers = #tpu.dot_dimension_numbers<[1], [0], [0], [1], [0, 0, 1, 1], [], []>} : vector<64x128xbf16>, vector<128x128xbf16>, vector<64x128xf32> -> vector<64x128xf32>
    %c0_3 = arith.constant 0 : index
    %c0_4 = arith.constant 0 : index
    %3 = vector.load %arg3[%c0_3, %c0_4] : memref<64x1xf32, #tpu.memory_space<vmem>>, vector<64x1xf32>
    %4 = vector.broadcast %3 : vector<64x1xf32> to vector<64x128xf32>
    %5 = arith.addf %2, %4 : vector<64x128xf32>
    %cst_5 = arith.constant 0.000000e+00 : f32
    %6 = vector.broadcast %cst_5 : f32 to vector<64x128xf32>
    %7 = arith.maximumf %5, %6 : vector<64x128xf32>
    %8 = arith.truncf %7 : vector<64x128xf32> to vector<64x128xbf16>
    %c0_6 = arith.constant 0 : index
    %c0_7 = arith.constant 0 : index
    %9 = vector.load %arg4[%c0_6, %c0_7] : memref<64x128xbf16, #tpu.memory_space<vmem>>, vector<64x128xbf16>
    tpu.vector_store %arg4[%c0_6, %c0_7], %8 {strides = array<i32>} : memref<64x128xbf16, #tpu.memory_space<vmem>>, vector<64x128xbf16>,
    return
  }
  func.func @transform_0(%arg0: i32) -> (i32, i32) {
    %c0_i32 = arith.constant 0 : i32
    %c0_i32_0 = arith.constant 0 : i32
    %c0_i32_1 = arith.constant 0 : i32
    return %c0_i32, %c0_i32_0 : i32, i32
  }
  func.func @transform_1(%arg0: i32) -> (i32, i32) {
    %c0_i32 = arith.constant 0 : i32
    %c0_i32_0 = arith.constant 0 : i32
    return %c0_i32, %arg0 : i32, i32
  }
  func.func @transform_2(%arg0: i32) -> (i32, i32) {
    %c0_i32 = arith.constant 0 : i32
    %c0_i32_0 = arith.constant 0 : i32
    %c0_i32_1 = arith.constant 0 : i32
    return %c0_i32, %c0_i32_0 : i32, i32
  }
  func.func @transform_3(%arg0: i32) -> (i32, i32) {
    %c0_i32 = arith.constant 0 : i32
    %c0_i32_0 = arith.constant 0 : i32
    return %c0_i32, %arg0 : i32, i32
  }
}

module attributes {stable_mosaic.version = 11 : i64} {
  func.func @kernel(%arg0: i32, %arg1: memref<1x64x64xbf16, #tpu.memory_space<vmem>>, %arg2: memref<8x64xbf16, #tpu.memory_space<vmem>>, %arg3: memref<64x8xbf16, #tpu.memory_space<vmem>>, %arg4: memref<4x64xbf16, #tpu.memory_space<vmem>>, %arg5: memref<64x4xbf16, #tpu.memory_space<vmem>>, %arg6: memref<2x64xbf16, #tpu.memory_space<vmem>>, %arg7: memref<64x2xbf16, #tpu.memory_space<vmem>>, %arg8: memref<1x8x8xf32, #tpu.memory_space<vmem>>, %arg9: memref<1x4x4xf32, #tpu.memory_space<vmem>>, %arg10: memref<1x2x2xf32, #tpu.memory_space<vmem>>) attributes {dimension_semantics = [#tpu.dimension_semantics<parallel>], iteration_bounds = array<i64: 2>, scalar_prefetch = 0 : i64, scratch_operands = 0 : i64, tpu.core_type = #tpu.core_type<tc>, window_params = [{transform_indices = @transform_0, window_bounds = array<i64: 1, 64, 64>}, {pipeline_mode = #tpu.pipeline_mode<synchronous>, transform_indices = @transform_1, window_bounds = array<i64: 8, 64>}, {pipeline_mode = #tpu.pipeline_mode<synchronous>, transform_indices = @transform_2, window_bounds = array<i64: 64, 8>}, {pipeline_mode = #tpu.pipeline_mode<synchronous>, transform_indices = @transform_3, window_bounds = array<i64: 4, 64>}, {pipeline_mode = #tpu.pipeline_mode<synchronous>, transform_indices = @transform_4, window_bounds = array<i64: 64, 4>}, {pipeline_mode = #tpu.pipeline_mode<synchronous>, transform_indices = @transform_5, window_bounds = array<i64: 2, 64>}, {pipeline_mode = #tpu.pipeline_mode<synchronous>, transform_indices = @transform_6, window_bounds = array<i64: 64, 2>}, {transform_indices = @transform_7, window_bounds = array<i64: 1, 8, 8>}, {transform_indices = @transform_8, window_bounds = array<i64: 1, 4, 4>}, {transform_indices = @transform_9, window_bounds = array<i64: 1, 2, 2>}]} {
    %c0 = arith.constant 0 : index
    %c0_0 = arith.constant 0 : index
    %c0_1 = arith.constant 0 : index
    %0 = vector.load %arg1[%c0, %c0_0, %c0_1] : memref<1x64x64xbf16, #tpu.memory_space<vmem>>, vector<1x64x64xbf16>
    %1 = vector.shape_cast %0 : vector<1x64x64xbf16> to vector<64x64xbf16>
    %2 = arith.extf %1 : vector<64x64xbf16> to vector<64x64xf32>
    %c0_2 = arith.constant 0 : index
    %c0_3 = arith.constant 0 : index
    %3 = vector.load %arg2[%c0_2, %c0_3] : memref<8x64xbf16, #tpu.memory_space<vmem>>, vector<8x64xbf16>
    %4 = arith.extf %3 : vector<8x64xbf16> to vector<8x64xf32>
    %c0_4 = arith.constant 0 : index
    %c0_5 = arith.constant 0 : index
    %5 = vector.load %arg3[%c0_4, %c0_5] : memref<64x8xbf16, #tpu.memory_space<vmem>>, vector<64x8xbf16>
    %6 = arith.extf %5 : vector<64x8xbf16> to vector<64x8xf32>
    %cst = arith.constant dense<0.000000e+00> : vector<64x8xf32>
    %7 = tpu.matmul %2, %6, %cst {dimension_numbers = #tpu.dot_dimension_numbers<[1], [0], [0], [1], [0, 0, 1, 1], [], []>} : vector<64x64xf32>, vector<64x8xf32>, vector<64x8xf32> -> vector<64x8xf32>
    %cst_6 = arith.constant dense<0.000000e+00> : vector<8x8xf32>
    %8 = tpu.matmul %4, %7, %cst_6 {dimension_numbers = #tpu.dot_dimension_numbers<[1], [0], [0], [1], [0, 0, 1, 1], [], []>} : vector<8x64xf32>, vector<64x8xf32>, vector<8x8xf32> -> vector<8x8xf32>
    %c0_7 = arith.constant 0 : index
    %c0_8 = arith.constant 0 : index
    %c0_9 = arith.constant 0 : index
    %9 = vector.load %arg8[%c0_7, %c0_8, %c0_9] : memref<1x8x8xf32, #tpu.memory_space<vmem>>, vector<1x8x8xf32>
    %10 = vector.shape_cast %9 : vector<1x8x8xf32> to vector<8x8xf32>
    %11 = vector.shape_cast %8 : vector<8x8xf32> to vector<1x8x8xf32>
    tpu.vector_store %arg8[%c0_7, %c0_8, %c0_9], %11 {strides = array<i32>} : memref<1x8x8xf32, #tpu.memory_space<vmem>>, vector<1x8x8xf32>,
    %c0_10 = arith.constant 0 : index
    %c0_11 = arith.constant 0 : index
    %12 = vector.load %arg4[%c0_10, %c0_11] : memref<4x64xbf16, #tpu.memory_space<vmem>>, vector<4x64xbf16>
    %13 = arith.extf %12 : vector<4x64xbf16> to vector<4x64xf32>
    %c0_12 = arith.constant 0 : index
    %c0_13 = arith.constant 0 : index
    %14 = vector.load %arg5[%c0_12, %c0_13] : memref<64x4xbf16, #tpu.memory_space<vmem>>, vector<64x4xbf16>
    %15 = arith.extf %14 : vector<64x4xbf16> to vector<64x4xf32>
    %cst_14 = arith.constant dense<0.000000e+00> : vector<64x4xf32>
    %16 = tpu.matmul %2, %15, %cst_14 {dimension_numbers = #tpu.dot_dimension_numbers<[1], [0], [0], [1], [0, 0, 1, 1], [], []>} : vector<64x64xf32>, vector<64x4xf32>, vector<64x4xf32> -> vector<64x4xf32>
    %cst_15 = arith.constant dense<0.000000e+00> : vector<4x4xf32>
    %17 = tpu.matmul %13, %16, %cst_15 {dimension_numbers = #tpu.dot_dimension_numbers<[1], [0], [0], [1], [0, 0, 1, 1], [], []>} : vector<4x64xf32>, vector<64x4xf32>, vector<4x4xf32> -> vector<4x4xf32>
    %c0_16 = arith.constant 0 : index
    %c0_17 = arith.constant 0 : index
    %c0_18 = arith.constant 0 : index
    %18 = vector.load %arg9[%c0_16, %c0_17, %c0_18] : memref<1x4x4xf32, #tpu.memory_space<vmem>>, vector<1x4x4xf32>
    %19 = vector.shape_cast %18 : vector<1x4x4xf32> to vector<4x4xf32>
    %20 = vector.shape_cast %17 : vector<4x4xf32> to vector<1x4x4xf32>
    tpu.vector_store %arg9[%c0_16, %c0_17, %c0_18], %20 {strides = array<i32>} : memref<1x4x4xf32, #tpu.memory_space<vmem>>, vector<1x4x4xf32>,
    %c0_19 = arith.constant 0 : index
    %c0_20 = arith.constant 0 : index
    %21 = vector.load %arg6[%c0_19, %c0_20] : memref<2x64xbf16, #tpu.memory_space<vmem>>, vector<2x64xbf16>
    %22 = arith.extf %21 : vector<2x64xbf16> to vector<2x64xf32>
    %c0_21 = arith.constant 0 : index
    %c0_22 = arith.constant 0 : index
    %23 = vector.load %arg7[%c0_21, %c0_22] : memref<64x2xbf16, #tpu.memory_space<vmem>>, vector<64x2xbf16>
    %24 = arith.extf %23 : vector<64x2xbf16> to vector<64x2xf32>
    %cst_23 = arith.constant dense<0.000000e+00> : vector<64x2xf32>
    %25 = tpu.matmul %2, %24, %cst_23 {dimension_numbers = #tpu.dot_dimension_numbers<[1], [0], [0], [1], [0, 0, 1, 1], [], []>} : vector<64x64xf32>, vector<64x2xf32>, vector<64x2xf32> -> vector<64x2xf32>
    %cst_24 = arith.constant dense<0.000000e+00> : vector<2x2xf32>
    %26 = tpu.matmul %22, %25, %cst_24 {dimension_numbers = #tpu.dot_dimension_numbers<[1], [0], [0], [1], [0, 0, 1, 1], [], []>} : vector<2x64xf32>, vector<64x2xf32>, vector<2x2xf32> -> vector<2x2xf32>
    %c0_25 = arith.constant 0 : index
    %c0_26 = arith.constant 0 : index
    %c0_27 = arith.constant 0 : index
    %27 = vector.load %arg10[%c0_25, %c0_26, %c0_27] : memref<1x2x2xf32, #tpu.memory_space<vmem>>, vector<1x2x2xf32>
    %28 = vector.shape_cast %27 : vector<1x2x2xf32> to vector<2x2xf32>
    %29 = vector.shape_cast %26 : vector<2x2xf32> to vector<1x2x2xf32>
    tpu.vector_store %arg10[%c0_25, %c0_26, %c0_27], %29 {strides = array<i32>} : memref<1x2x2xf32, #tpu.memory_space<vmem>>, vector<1x2x2xf32>,
    return
  }
  func.func @transform_0(%arg0: i32) -> (i32, i32, i32) {
    %c0_i32 = arith.constant 0 : i32
    %c0_i32_0 = arith.constant 0 : i32
    %c0_i32_1 = arith.constant 0 : i32
    return %arg0, %c0_i32, %c0_i32_0 : i32, i32, i32
  }
  func.func @transform_1(%arg0: i32) -> (i32, i32) {
    %c0_i32 = arith.constant 0 : i32
    %c0_i32_0 = arith.constant 0 : i32
    %c0_i32_1 = arith.constant 0 : i32
    return %c0_i32, %c0_i32_0 : i32, i32
  }
  func.func @transform_2(%arg0: i32) -> (i32, i32) {
    %c0_i32 = arith.constant 0 : i32
    %c0_i32_0 = arith.constant 0 : i32
    %c0_i32_1 = arith.constant 0 : i32
    return %c0_i32, %c0_i32_0 : i32, i32
  }
  func.func @transform_3(%arg0: i32) -> (i32, i32) {
    %c0_i32 = arith.constant 0 : i32
    %c0_i32_0 = arith.constant 0 : i32
    %c0_i32_1 = arith.constant 0 : i32
    return %c0_i32, %c0_i32_0 : i32, i32
  }
  func.func @transform_4(%arg0: i32) -> (i32, i32) {
    %c0_i32 = arith.constant 0 : i32
    %c0_i32_0 = arith.constant 0 : i32
    %c0_i32_1 = arith.constant 0 : i32
    return %c0_i32, %c0_i32_0 : i32, i32
  }
  func.func @transform_5(%arg0: i32) -> (i32, i32) {
    %c0_i32 = arith.constant 0 : i32
    %c0_i32_0 = arith.constant 0 : i32
    %c0_i32_1 = arith.constant 0 : i32
    return %c0_i32, %c0_i32_0 : i32, i32
  }
  func.func @transform_6(%arg0: i32) -> (i32, i32) {
    %c0_i32 = arith.constant 0 : i32
    %c0_i32_0 = arith.constant 0 : i32
    %c0_i32_1 = arith.constant 0 : i32
    return %c0_i32, %c0_i32_0 : i32, i32
  }
  func.func @transform_7(%arg0: i32) -> (i32, i32, i32) {
    %c0_i32 = arith.constant 0 : i32
    %c0_i32_0 = arith.constant 0 : i32
    %c0_i32_1 = arith.constant 0 : i32
    return %arg0, %c0_i32, %c0_i32_0 : i32, i32, i32
  }
  func.func @transform_8(%arg0: i32) -> (i32, i32, i32) {
    %c0_i32 = arith.constant 0 : i32
    %c0_i32_0 = arith.constant 0 : i32
    %c0_i32_1 = arith.constant 0 : i32
    return %arg0, %c0_i32, %c0_i32_0 : i32, i32, i32
  }
  func.func @transform_9(%arg0: i32) -> (i32, i32, i32) {
    %c0_i32 = arith.constant 0 : i32
    %c0_i32_0 = arith.constant 0 : i32
    %c0_i32_1 = arith.constant 0 : i32
    return %arg0, %c0_i32, %c0_i32_0 : i32, i32, i32
  }
}

</mosaic_0001>

<bundles_post_ra>
// kernel: _forward_impl.5
= control target key start
LH: loop header
LB: loop body
LE: loop exit
PB: predicated region body
PF: predicated region fallthrough
CT: control target
= control target key end

     0   :  { %s493_s12 = smov 0   ;;  %s495_s13 = smov 0   ;;  %s551_s0 = inlined_call_operand.vmem [shape: bf16[8,48], index: 0, kind: input, shape index: {}]   ;;  %s552_s1 = inlined_call_operand.vmem [shape: bf16[48,512], index: 1, kind: input, shape index: {}]   ;;  %s553_s2 = inlined_call_operand.vmem [shape: f32[8,1], index: 2, kind: input, shape index: {}]   ;;  %s554_s3 = inlined_call_operand.vmem [shape: bf16[8,512], index: 3, kind: output, shape index: {}]  }
   0x1   :  { %s497_s14 = smov 0  }
   0x2 LB: > { %s390_s15 = sadd.s32 4294967295, %s470_s14   ;;  %s510_s16 = sadd.s32 1, %s470_s14   ;;  %s470_s14 = sphi %s497_s14, %s557_s14   ;;  %s466_s13 = sphi %s495_s13, %s556_s13   ;;  %s462_s12 = sphi %s493_s12, %s555_s12  }
   0x3   : > { %s38_s17 = ssub.s32 %s470_s14, %s510_s16  ;;  %s41_s18 = sadd.s32 1, %s466_s13 }
   0x4   : > { %p39_p0 = scmp.eq.s32.totalorder %s38_s17, 0  ;;  %p48_p1 = scmp.ne.s32.totalorder %s466_s13, %s462_s12 }
   0x5   : > { %p49_p2 = scmp.eq.s32.totalorder %s470_s14, 0  ;;  %p393_p4 = scmp.ge.s32.totalorder %s470_s14, 2 }
   0x6   : > { %s519_s19 = scalar_select %p39_p0, %s466_s13, %s41_s18  }
   0x7   : > { %p50_p3 = por %p49_p2, %p48_p1  ;;  %127 = sbr.rel (%p393_p4) target bundleno = 21 (0x15), region = 24 }
   0xe   : > { %130 = sbr.rel (!%p50_p3) target bundleno = 21 (0x15), region = 28  ;;  %s132_s20 = sand.u32 (%p50_p3), 1, %s466_s13  }
   0xf   : > { %s409_s21 = sshll.u32 (%p50_p3), %s470_s14, 3  ;;  %s411_s22 = smul.u32 (%p50_p3), 48, %s132_s20 }
  0x10   : > { %s137_s25 = scalar_lea.vmem (%p50_p3), %s552_s1, %s409_s21 }
  0x11   : > { %v175_v0 = vld [vmem:[%s137_s25] sm:$0xff] (%p50_p3)  ;;  %v177_v1 = vld [vmem:[%s137_s25 + $0x10] sm:$0xff] (%p50_p3)  ;;  %s134_s26 = scalar_lea.vmem (%p50_p3), [#allocation2], %s411_s22 }
  0x12   : > { %v179_v2 = vld [vmem:[%s137_s25 + $0x20] sm:$0xff] (%p50_p3)  ;;  %v181_v3 = vld [vmem:[%s137_s25 + $0x30] sm:$0xff] (%p50_p3)  ;;  %176 = vst [vmem:[%s134_s26] sm:$0xff] (%p50_p3), %v175_v0  ;;  %178 = vst [vmem:[%s134_s26 + $0x8] sm:$0xff] (%p50_p3), %v177_v1 }
  0x13   : > { %v183_v4 = vld [vmem:[%s137_s25 + $0x40] sm:$0xff] (%p50_p3)  ;;  %v185_v5 = vld [vmem:[%s137_s25 + $0x50] sm:$0xff] (%p50_p3)  ;;  %180 = vst [vmem:[%s134_s26 + $0x10] sm:$0xff] (%p50_p3), %v179_v2  ;;  %182 = vst [vmem:[%s134_s26 + $0x18] sm:$0xff] (%p50_p3), %v181_v3 }
  0x14   : > { %184 = vst [vmem:[%s134_s26 + $0x20] sm:$0xff] (%p50_p3), %v183_v4  ;;  %186 = vst [vmem:[%s134_s26 + $0x28] sm:$0xff] (%p50_p3), %v185_v5 }
  0x15 PF: > { %p396_p5 = scmp.ge.s32.totalorder %s470_s14, 1  ;;  %p191_p6 = scmp.lt.s32.totalorder %s470_s14, 3 }
  0x17   : > { %p192_p7 = pnand %p396_p5, %p191_p6 }
  0x18   : > { %s198_s27 = sand.u32 (!%p192_p7), 1, %s462_s12   ;;  %v236_v6 = vld [vmem:[%s553_s2] sm:$0xff] (!%p192_p7)  ;;  %v472_v7 = vmov (!%p192_p7), 0   ;;  %vm272_vm0 = vcmask (!%p192_p7), 392192   ;;  %s397_s7 = sshll.u32 (!%p192_p7), %s390_s15, 1 }
  0x19   : > { %195 = sbr.rel (%p192_p7) target bundleno = 262 (0x106), region = 66  ;;  %308 = vmatprep.mubr.bf16.mxu0 (!%p192_p7), %v472_v7  ;;  %438 = vset.pattern.permute.xlu0 (!%p192_p7), %v472_v7  ;;  %v229_v14 = vld [vmem:[%s551_s0] sm:$0xf] (!%p192_p7)  ;;  %p223_p8 = scmp.lt.s32.totalorder (!%p192_p7), %s397_s7, 3 }
  0x1a   : > { %s412_s30 = smul.u32 (!%p192_p7), 48, %s198_s27  ;;  %239 = vperm.xlu0 (!%p192_p7), %438, %v236_v6  }
  0x1c   : > { %s200_s4 = scalar_lea.vmem (!%p192_p7), [#allocation2], %s412_s30 }
  0x1d   : > { %v439_v8 = vld [vmem:[%s200_s4 + $0x4] ss:$8 sps:$4 sm:$0xff] (!%p192_p7)   ;;  %v441_v9 = vld [vmem:[%s200_s4] ss:$8 sps:$4 sm:$0xff] (!%p192_p7)   ;;  %v442_v10 = vld [vmem:[%s200_s4 + $0x14] ss:$8 sps:$4 sm:$0xff] (!%p192_p7)  }
  0x1e   : > { %276 = vmatprep.subr.bf16.mxu0 (!%p192_p7), %v439_v8  ;;  %v444_v11 = vld [vmem:[%s200_s4 + $0x10] ss:$8 sps:$4 sm:$0xff] (!%p192_p7)   ;;  %v445_v12 = vld [vmem:[%s200_s4 + $0x24] ss:$8 sps:$4 sm:$0xff] (!%p192_p7)   ;;  %v447_v13 = vld [vmem:[%s200_s4 + $0x20] ss:$8 sps:$4 sm:$0xff] (!%p192_p7)  }
  0x1f   : > { %277 = vmatpush1.bf16.msra.mxu0 (!%p192_p7), %v441_v9 }
  0x20   : > { %278 = vmatprep.subr.bf16.mxu0 %v442_v10  ;;  %s559_s7 = smov (!%p223_p8, %s397_s7), 3 }
  0x21   : > { %s398_s8 = sshll.u32 %s559_s7, 2 }
  0x22   : > { %s226_s11 = scalar_lea.vmem %s554_s3, %s398_s8 }
  0x23   : > { %279 = vmatpush1.bf16.msra.mxu0 %v444_v11 }
  0x24   : > { %280 = vmatprep.subr.bf16.mxu0 %v445_v12 }
  0x27   : > { %281 = vmatpush1.bf16.msra.mxu0 %v447_v13 }
  0x2a   : > { %405 = vmatmul.mubr.msk.bf16.vlgmr.msra.gmra.mrb[0].mxu0 %vm272_vm0, %v229_v14 }
  0x99   : > { %v240_v15 = vpop.permute.xlu0 %239 }
  0xfd   : > { %v310_v16 = vpop.f32.mrb[0].mxu0 }
  0xfe   : > { %v311_v17 = vadd.f32 %v310_v16, %v240_v15  ;;  %v312_v18 = vpop.f32.mrb[1].mxu0 }
  0xff   : > { %v313_v19 = vadd.f32 %v312_v18, %v240_v15  ;;  %v314_v20 = vpop.f32.mrb[2].mxu0 }
 0x100   : > { %v317_v21 = vmax.f32 %v311_v17, 0.0  ;;  %v315_v22 = vpop.f32.mrb[3].mxu0 }
 0x101   : > { %v318_v23 = vmax.f32 %v313_v19, 0.0 }
 0x103   : > { %v410_v24 = vpack.c.bf16 %v318_v23, %v317_v21 }
 0x105   : > { %327 = vst [vmem:[%s226_s11] sm:$0xff] %v410_v24 }
 0x106 PF: > { %p10_p9 = scmp.ge.s32.totalorder %s510_s16, 4   ;;  %s555_s12 = smov %s466_s13 }
 0x107   : > { %s556_s13 = smov %s519_s19  ;;  %s557_s14 = smov %s510_s16 }
 0x108   :  { %12 = sbr.rel (!%p10_p9) target bundleno = 2 (0x2), region = 105 }

// kernel: _forward_impl.6
= control target key start
LH: loop header
LB: loop body
LE: loop exit
PB: predicated region body
PF: predicated region fallthrough
CT: control target
= control target key end

     0   :  { %v142_v0 = vmov 0.0   ;;  %vm143_vm0 = vmmov 0   ;;  %v144_v2 = vmov 0   ;;  %vm50_vm1 = vcmask 261120   ;;  %s183_s1 = inlined_call_operand.vmem [shape: bf16[32,128], index: 1, kind: input, shape index: {}]   ;;  %s184_s2 = inlined_call_operand.vmem [shape: f32[16,1], index: 2, kind: input, shape index: {}]   ;;  %s185_s0 = inlined_call_operand.vmem [shape: bf16[16,32], index: 0, kind: input, shape index: {}]   ;;  %s186_s3 = inlined_call_operand.vmem [shape: bf16[16,128], index: 3, kind: output, shape index: {}]  }
   0x1   :  { %127 = vmatprep.subr.bf16.mxu0 %v142_v0  ;;  %v139_v1 = vld [vmem:[%s183_s1] sm:$0xff]   ;;  %131 = vmatprep.mubr.msk.bf16.mxu0 %vm143_vm0, %v142_v0  ;;  %v140_v3 = vld [vmem:[%s183_s1 + $0x8] sm:$0xff]  }
   0x2   :  { %138 = vset.pattern.permute.xlu0 %v144_v2  ;;  %128 = vmatpush3.bf16.msra.mxu0 %v139_v1  ;;  %v21_v4 = vld [vmem:[%s184_s2] sm:$0xff]  ;;  %v22_v6 = vld [vmem:[%s184_s2 + $0x8] sm:$0xff] }
   0x3   :  { %129 = vmatprep.subr.bf16.mxu0 %v142_v0  ;;  %25 = vperm.xlu0 %138, %v21_v4   ;;  %v141_v5 = vld [vmem:[%s185_s0] sm:$0xff]  }
   0x6   :  { %130 = vmatpush3.bf16.msra.mxu0 %v140_v3 }
   0x7   :  { %30 = vperm.xlu0 %138, %v22_v6  }
   0x9   :  { %132 = vmatmul.mubr.msk.bf16.vlgmr.msra.gmra.mrb[0].mxu0 %vm50_vm1, %v141_v5 }
  0x82   :  { %v26_v7 = vpop.permute.xlu0 %25 }
  0x86   :  { %v31_v11 = vpop.permute.xlu0 %30 }
  0xdc   :  { %v88_v8 = vpop.f32.mrb[0].mxu0 }
  0xdd   :  { %v89_v9 = vadd.f32 %v88_v8, %v26_v7  ;;  %v133_v10 = vpop.f32.mrb[1].mxu0 }
  0xde   :  { %v91_v12 = vpop.f32.mrb[2].mxu0 }
  0xdf   :  { %v92_v13 = vadd.f32 %v91_v12, %v31_v11  ;;  %v134_v14 = vpop.f32.mrb[3].mxu0  ;;  %v95_v15 = vmax.f32 %v89_v9, 0.0 }
  0xe1   :  { %v96_v16 = vmax.f32 %v92_v13, 0.0 }
  0xe3   :  { %v122_v17 = vpack.c.bf16 %v96_v16, %v95_v15 }
  0xe5   :  { %123 = vst [vmem:[%s186_s3] sm:$0xff] %v122_v17  }

// kernel: _forward_impl.7
= control target key start
LH: loop header
LB: loop body
LE: loop exit
PB: predicated region body
PF: predicated region fallthrough
CT: control target
= control target key end

     0   :  { %v223_v1 = vmov 0   ;;  %vm85_vm0 = vcmask 523264   ;;  %s282_s1 = inlined_call_operand.vmem [shape: bf16[64,128], index: 1, kind: input, shape index: {}]   ;;  %s283_s0 = inlined_call_operand.vmem [shape: bf16[32,64], index: 0, kind: input, shape index: {}]   ;;  %s284_s2 = inlined_call_operand.vmem [shape: f32[32,1], index: 2, kind: input, shape index: {}]   ;;  %s285_s3 = inlined_call_operand.vmem [shape: bf16[32,128], index: 3, kind: output, shape index: {}]  }
   0x1   :  { %v217_v0 = vld [vmem:[%s282_s1] sm:$0xff]   ;;  %216 = vset.pattern.permute.xlu1 %v223_v1  ;;  %215 = vset.pattern.permute.xlu0 %v223_v1  ;;  %v218_v2 = vld [vmem:[%s282_s1 + $0x8] sm:$0xff]   ;;  %v219_v3 = vld [vmem:[%s282_s1 + $0x10] sm:$0xff]  }
   0x2   :  { %202 = vmatprep.subr.bf16.mxu0 %v217_v0  ;;  %v221_v4 = vld [vmem:[%s283_s0] sm:$0xff]   ;;  %v29_v5 = vld [vmem:[%s284_s2 + $0x10] sm:$0xff]  ;;  %v220_v7 = vld [vmem:[%s282_s1 + $0x18] sm:$0xff]  }
   0x3   :  { %203 = vmatpush3.bf16.msra.mxu0 %v217_v0  ;;  %210 = vmatprep.mubr.msk.bf16.mxu0 %vm85_vm0, %v221_v4  ;;  %v27_v6 = vld [vmem:[%s284_s2] sm:$0xff]  ;;  %v30_v8 = vld [vmem:[%s284_s2 + $0x18] sm:$0xff]  ;;  %v28_v9 = vld [vmem:[%s284_s2 + $0x8] sm:$0xff] }
   0x4   :  { %204 = vmatprep.subr.bf16.mxu0 %v218_v2  ;;  %43 = vperm.xlu1 %216, %v29_v5   ;;  %v222_v10 = vld [vmem:[%s283_s0 + $0x8] sm:$0xff]  }
   0x5   :  { %33 = vperm.xlu0 %215, %v27_v6  }
   0x7   :  { %205 = vmatpush3.bf16.msra.mxu0 %v218_v2 }
   0x8   :  { %206 = vmatprep.subr.bf16.mxu0 %v219_v3  ;;  %48 = vperm.xlu1 %216, %v30_v8  }
   0x9   :  { %38 = vperm.xlu0 %215, %v28_v9  }
   0xb   :  { %207 = vmatpush3.bf16.msra.mxu0 %v219_v3 }
   0xc   :  { %208 = vmatprep.subr.bf16.mxu0 %v220_v7 }
   0xf   :  { %209 = vmatpush3.bf16.msra.mxu0 %v220_v7 }
  0x12   :  { %211 = vmatmul.mubr.msk.bf16.vlgmr.msra.gmra.mrb[0].mxu0 %vm85_vm0, %v222_v10 }
  0x83   :  { %v44_v11 = vpop.permute.xlu1 %43 }
  0x84   :  { %v34_v12 = vpop.permute.xlu0 %33 }
  0x87   :  { %v49_v16 = vpop.permute.xlu1 %48 }
  0x88   :  { %v39_v19 = vpop.permute.xlu0 %38 }
  0xe5   :  { %v212_v13 = vpop.f32.mrb[0].mxu0 }
  0xe6   :  { %v135_v14 = vadd.f32 %v212_v13, %v44_v11  ;;  %v126_v15 = vpop.f32.mrb[1].mxu0 }
  0xe7   :  { %v127_v17 = vadd.f32 %v126_v15, %v34_v12  ;;  %v213_v18 = vpop.f32.mrb[2].mxu0 }
  0xe8   :  { %v138_v20 = vadd.f32 %v213_v18, %v49_v16  ;;  %v129_v21 = vpop.f32.mrb[3].mxu0  ;;  %v143_v23 = vmax.f32 %v135_v14, 0.0 }
  0xe9   :  { %v130_v22 = vadd.f32 %v129_v21, %v39_v19  ;;  %v141_v25 = vmax.f32 %v127_v17, 0.0 }
  0xea   :  { %v144_v24 = vmax.f32 %v138_v20, 0.0 }
  0xeb   :  { %v142_v26 = vmax.f32 %v130_v22, 0.0 }
  0xec   :  { %v193_v27 = vpack.c.bf16 %v144_v24, %v143_v23 }
  0xed   :  { %v188_v28 = vpack.c.bf16 %v142_v26, %v141_v25 }
  0xee   :  { %195 = vst [vmem:[%s285_s3 + $0x8] sm:$0xff] %v193_v27  }
  0xef   :  { %189 = vst [vmem:[%s285_s3] sm:$0xff] %v188_v28  }

// kernel: _forward_impl.8
= control target key start
LH: loop header
LB: loop body
LE: loop exit
PB: predicated region body
PF: predicated region fallthrough
CT: control target
= control target key end

     0   :  { %v394_v1 = vmov 0   ;;  %s487_s1 = inlined_call_operand.vmem [shape: bf16[128,128], index: 1, kind: input, shape index: {}]   ;;  %s488_s0 = inlined_call_operand.vmem [shape: bf16[64,128], index: 0, kind: input, shape index: {}]   ;;  %s489_s2 = inlined_call_operand.vmem [shape: f32[64,1], index: 2, kind: input, shape index: {}]   ;;  %s490_s3 = inlined_call_operand.vmem [shape: bf16[64,128], index: 3, kind: output, shape index: {}]  }
   0x1   :  { %v382_v0 = vld [vmem:[%s487_s1] sm:$0xff]   ;;  %381 = vset.pattern.permute.xlu1 %v394_v1  ;;  %380 = vset.pattern.permute.xlu0 %v394_v1  ;;  %v383_v2 = vld [vmem:[%s487_s1 + $0x8] sm:$0xff]   ;;  %v384_v3 = vld [vmem:[%s487_s1 + $0x10] sm:$0xff]  }
   0x2   :  { %339 = vmatprep.subr.bf16.mxu0 %v382_v0  ;;  %363 = vmatprep.subr.bf16.mxu1 %v382_v0  ;;  %v385_v4 = vld [vmem:[%s487_s1 + $0x18] sm:$0xff]   ;;  %v390_v5 = vld [vmem:[%s488_s0] sm:$0xff]   ;;  %v391_v6 = vld [vmem:[%s488_s0 + $0x10] sm:$0xff]  }
   0x3   :  { %340 = vmatpush3.bf16.msra.mxu0 %v382_v0  ;;  %371 = vmatpush3.bf16.msra.mxu1 %v382_v0  ;;  %v386_v7 = vld [vmem:[%s487_s1 + $0x20] sm:$0xff]   ;;  %v41_v8 = vld [vmem:[%s489_s2 + $0x10] sm:$0xff]  ;;  %v42_v10 = vld [vmem:[%s489_s2 + $0x18] sm:$0xff] }
   0x4   :  { %341 = vmatprep.subr.bf16.mxu0 %v383_v2  ;;  %364 = vmatprep.subr.bf16.mxu1 %v383_v2  ;;  %v39_v9 = vld [vmem:[%s489_s2] sm:$0xff]  ;;  %v40_v11 = vld [vmem:[%s489_s2 + $0x8] sm:$0xff]  ;;  %v388_v15 = vld [vmem:[%s487_s1 + $0x30] sm:$0xff]  }
   0x5   :  { %355 = vmatprep.mubr.bf16.mxu0 %v390_v5  ;;  %359 = vmatprep.mubr.bf16.mxu1 %v391_v6  ;;  %v387_v12 = vld [vmem:[%s487_s1 + $0x28] sm:$0xff]   ;;  %v43_v14 = vld [vmem:[%s489_s2 + $0x20] sm:$0xff]  ;;  %v46_v16 = vld [vmem:[%s489_s2 + $0x38] sm:$0xff] }
   0x6   :  { %59 = vperm.xlu1 %381, %v41_v8   ;;  %49 = vperm.xlu0 %380, %v39_v9   ;;  %v44_v13 = vld [vmem:[%s489_s2 + $0x28] sm:$0xff]  ;;  %v45_v17 = vld [vmem:[%s489_s2 + $0x30] sm:$0xff]  ;;  %v389_v18 = vld [vmem:[%s487_s1 + $0x38] sm:$0xff]  }
   0x7   :  { %342 = vmatpush3.bf16.msra.mxu0 %v383_v2  ;;  %372 = vmatpush3.bf16.msra.mxu1 %v383_v2  ;;  %v392_v19 = vld [vmem:[%s488_s0 + $0x8] sm:$0xff]   ;;  %v393_v20 = vld [vmem:[%s488_s0 + $0x18] sm:$0xff]  }
   0x8   :  { %343 = vmatprep.subr.bf16.mxu0 %v384_v3  ;;  %365 = vmatprep.subr.bf16.mxu1 %v384_v3 }
   0xa   :  { %64 = vperm.xlu1 %381, %v42_v10   ;;  %54 = vperm.xlu0 %380, %v40_v11  }
   0xb   :  { %344 = vmatpush3.bf16.msra.mxu0 %v384_v3  ;;  %373 = vmatpush3.bf16.msra.mxu1 %v384_v3 }
   0xc   :  { %345 = vmatprep.subr.bf16.mxu0 %v385_v4  ;;  %366 = vmatprep.subr.bf16.mxu1 %v385_v4 }
   0xe   :  { %74 = vperm.xlu1 %381, %v44_v13   ;;  %69 = vperm.xlu0 %380, %v43_v14  }
   0xf   :  { %346 = vmatpush3.bf16.msra.mxu0 %v385_v4  ;;  %374 = vmatpush3.bf16.msra.mxu1 %v385_v4 }
  0x10   :  { %347 = vmatprep.subr.bf16.mxu0 %v386_v7  ;;  %367 = vmatprep.subr.bf16.mxu1 %v386_v7 }
  0x12   :  { %84 = vperm.xlu1 %381, %v46_v16   ;;  %79 = vperm.xlu0 %380, %v45_v17  }
  0x13   :  { %348 = vmatpush3.bf16.msra.mxu0 %v386_v7  ;;  %375 = vmatpush3.bf16.msra.mxu1 %v386_v7 }
  0x14   :  { %349 = vmatprep.subr.bf16.mxu0 %v387_v12  ;;  %368 = vmatprep.subr.bf16.mxu1 %v387_v12 }
  0x17   :  { %350 = vmatpush3.bf16.msra.mxu0 %v387_v12  ;;  %376 = vmatpush3.bf16.msra.mxu1 %v387_v12 }
  0x18   :  { %351 = vmatprep.subr.bf16.mxu0 %v388_v15  ;;  %369 = vmatprep.subr.bf16.mxu1 %v388_v15 }
  0x1b   :  { %352 = vmatpush3.bf16.msra.mxu0 %v388_v15  ;;  %377 = vmatpush3.bf16.msra.mxu1 %v388_v15 }
  0x1c   :  { %353 = vmatprep.subr.bf16.mxu0 %v389_v18  ;;  %370 = vmatprep.subr.bf16.mxu1 %v389_v18 }
  0x1f   :  { %354 = vmatpush3.bf16.msra.mxu0 %v389_v18  ;;  %378 = vmatpush3.bf16.msra.mxu1 %v389_v18 }
  0x22   :  { %356 = vmatmul.mubr.bf16.vlgmr.msra.gmra.mrb[0].mxu0 %v392_v19  ;;  %360 = vmatmul.mubr.bf16.vlgmr.msra.gmra.mrb[0].mxu1 %v393_v20 }
  0x85   :  { %v60_v21 = vpop.permute.xlu1 %59  ;;  %v50_v22 = vpop.permute.xlu0 %49 }
  0x89   :  { %v65_v23 = vpop.permute.xlu1 %64  ;;  %v55_v24 = vpop.permute.xlu0 %54 }
  0x8d   :  { %v75_v25 = vpop.permute.xlu1 %74  ;;  %v70_v26 = vpop.permute.xlu0 %69 }
  0x91   :  { %v85_v27 = vpop.permute.xlu1 %84  ;;  %v80_v28 = vpop.permute.xlu0 %79 }
  0xf5   :  { %v357_v29 = vpop.f32.mrb[0].mxu0  ;;  %v361_v30 = vpop.f32.mrb[0].mxu1 }
  0xf6   :  { %v202_v31 = vadd.f32 %v357_v29, %v60_v21  ;;  %v218_v32 = vadd.f32 %v361_v30, %v80_v28  ;;  %v193_v33 = vpop.f32.mrb[1].mxu0  ;;  %v209_v34 = vpop.f32.mrb[1].mxu1 }
  0xf7   :  { %v194_v35 = vadd.f32 %v193_v33, %v50_v22  ;;  %v210_v36 = vadd.f32 %v209_v34, %v70_v26  ;;  %v358_v37 = vpop.f32.mrb[2].mxu0  ;;  %v362_v38 = vpop.f32.mrb[2].mxu1 }
  0xf8   :  { %v205_v39 = vadd.f32 %v358_v37, %v65_v23  ;;  %v221_v40 = vadd.f32 %v362_v38, %v85_v27  ;;  %v196_v41 = vpop.f32.mrb[3].mxu0  ;;  %v212_v42 = vpop.f32.mrb[3].mxu1  ;;  %v226_v45 = vmax.f32 %v202_v31, 0.0  ;;  %v230_v46 = vmax.f32 %v218_v32, 0.0 }
  0xf9   :  { %v197_v43 = vadd.f32 %v196_v41, %v55_v24  ;;  %v213_v44 = vadd.f32 %v212_v42, %v75_v25  ;;  %v224_v49 = vmax.f32 %v194_v35, 0.0  ;;  %v228_v50 = vmax.f32 %v210_v36, 0.0 }
  0xfa   :  { %v227_v47 = vmax.f32 %v205_v39, 0.0  ;;  %v231_v48 = vmax.f32 %v221_v40, 0.0 }
  0xfb   :  { %v225_v51 = vmax.f32 %v197_v43, 0.0  ;;  %v229_v52 = vmax.f32 %v213_v44, 0.0 }
  0xfc   :  { %v312_v53 = vpack.c.bf16 %v227_v47, %v226_v45  ;;  %v322_v54 = vpack.c.bf16 %v231_v48, %v230_v46 }
  0xfd   :  { %v307_v55 = vpack.c.bf16 %v225_v51, %v224_v49  ;;  %v317_v56 = vpack.c.bf16 %v229_v52, %v228_v50 }
  0xfe   :  { %324 = vst [vmem:[%s490_s3 + $0x8] sm:$0xff] %v312_v53   ;;  %326 = vst [vmem:[%s490_s3 + $0x18] sm:$0xff] %v322_v54  }
  0xff   :  { %308 = vst [vmem:[%s490_s3] sm:$0xff] %v307_v55   ;;  %325 = vst [vmem:[%s490_s3 + $0x10] sm:$0xff] %v317_v56  }

// kernel: _forward_impl.9
= control target key start
LH: loop header
LB: loop body
LE: loop exit
PB: predicated region body
PF: predicated region fallthrough
CT: control target
= control target key end

     0   :  { %s1590_s30 = smov 0   ;;  %s1706_s0 = inlined_call_operand.vmem [shape: bf16[2,64,64], index: 0, kind: input, shape index: {}]   ;;  %s1707_s1 = inlined_call_operand.vmem [shape: bf16[8,64], index: 1, kind: input, shape index: {}]   ;;  %s1708_s2 = inlined_call_operand.vmem [shape: bf16[64,8], index: 2, kind: input, shape index: {}]   ;;  %s1709_s3 = inlined_call_operand.vmem [shape: bf16[4,64], index: 3, kind: input, shape index: {}]   ;;  %s1710_s4 = inlined_call_operand.vmem [shape: bf16[64,4], index: 4, kind: input, shape index: {}]   ;;  %s1711_s5 = inlined_call_operand.vmem [shape: bf16[2,64], index: 5, kind: input, shape index: {}]   ;;  %s1712_s6 = inlined_call_operand.vmem [shape: bf16[64,2], index: 6, kind: input, shape index: {}]   ;;  %s1713_s7 = inlined_call_operand.vmem [shape: f32[2,8,8], index: 7, kind: output, shape index: {0}]   ;;  %s1714_s8 = inlined_call_operand.vmem [shape: f32[2,4,4], index: 8, kind: output, shape index: {1}]   ;;  %s1715_s9 = inlined_call_operand.vmem [shape: f32[2,2,2], index: 9, kind: output, shape index: {2}]  }
   0x1 LB: > { %s1102_s10 = sadd.s32 4294967295, %s1535_s30   ;;  %p1106_p0 = scmp.ge.s32.totalorder %s1535_s30, 1  ;;  %s1535_s30 = sphi %s1590_s30, %s20_s30  }
   0x2   : > { %p292_p1 = scmp.lt.s32.totalorder %s1535_s30, 3 }
   0x4   : > { %p293_p2 = pnand %p1106_p0, %p292_p1 }
   0x5   : > { %v1159_v0 = vld [vmem:[%s1708_s2] sm:$0xff] (!%p293_p2)   ;;  %v1209_v1 = vld [vmem:[%s1708_s2 + $0x8] sm:$0xff] (!%p293_p2)   ;;  %p335_p3 = scmp.lt.s32.totalorder (!%p293_p2), %s1102_s10, 1  ;;  %v1210_v2 = vld [vmem:[%s1708_s2 + $0x10] sm:$0xff] (!%p293_p2)   ;;  %vm386_vm0 = vcmask (!%p293_p2), 523264   ;;  %v1537_v24 = vmov (!%p293_p2), 0.0|0.0  }
   0x6   : > { %296 = sbr.rel (%p293_p2) target bundleno = 497 (0x1f1), region = 48  ;;  %1435 = vmatprep.subr.bf16.mxu0 (!%p293_p2), %v1159_v0  ;;  %v1211_v5 = vld [vmem:[%s1708_s2 + $0x18] sm:$0xff] (!%p293_p2)   ;;  %v1175_v7 = vld [vmem:[%s1710_s4] sm:$0xff] (!%p293_p2)   ;;  %v1212_v11 = vld [vmem:[%s1710_s4 + $0x8] sm:$0xff] (!%p293_p2)   ;;  %1450 = vmatprep.subr.bf16.mxu1 (!%p293_p2), %v1537_v24  ;;  %vm1538_vm1 = vmmov (!%p293_p2), 0   ;;  %v1539_v25 = vmov (!%p293_p2), 0.0  }
   0x7   : > { %1437 = vmatpush3.bf16.msra.mxu0 (!%p293_p2), %v1159_v0  ;;  %v1213_v15 = vld [vmem:[%s1710_s4 + $0x10] sm:$0xff] (!%p293_p2)   ;;  %v1214_v18 = vld [vmem:[%s1710_s4 + $0x18] sm:$0xff] (!%p293_p2)   ;;  %v1191_v20 = vld [vmem:[%s1712_s6] sm:$0xff] (!%p293_p2)   ;;  %1337 = vmatprep.mubr.msk.f32.mxu1 (!%p293_p2), %vm1538_vm1, %v1539_v25  ;;  %vm589_vm2 = vcmask (!%p293_p2), 64512   ;;  %vm787_vm3 = vcmask (!%p293_p2), 27648   ;;  %vm985_vm4 = vcmask (!%p293_p2), 9216  }
   0x8   : > { %1439 = vmatprep.subr.bf16.mxu0 (!%p293_p2), %v1209_v1  ;;  %v1215_v21 = vld [vmem:[%s1712_s6 + $0x8] sm:$0xff] (!%p293_p2)   ;;  %v1216_v22 = vld [vmem:[%s1712_s6 + $0x10] sm:$0xff] (!%p293_p2)   ;;  %v1217_v23 = vld [vmem:[%s1712_s6 + $0x18] sm:$0xff] (!%p293_p2)  }
   0x9   : > { %v368_v36 = vld [vmem:[%s1707_s1] sm:$0xf] (!%p293_p2) }
   0xa   : > { %v369_v39 = vunpack.c.l.bf16 (!%p293_p2), %v368_v36  ;;  %v591_v50 = vld [vmem:[%s1709_s3] sm:$0x3] (!%p293_p2) }
   0xb   : > { %1441 = vmatpush3.bf16.msra.mxu0 (!%p293_p2), %v1209_v1  ;;  %v592_v53 = vunpack.c.l.bf16 (!%p293_p2), %v591_v50  ;;  %v789_v0 = vld [vmem:[%s1711_s5] sm:$0x1] (!%p293_p2) }
   0xc   : > { %1443 = vmatprep.subr.bf16.mxu0 (!%p293_p2), %v1210_v2 }
   0xd   : > { %s1717_s10 = smov (!%p335_p3, %s1102_s10), 1 }
   0xe   : > { %s1141_s17 = sshll.u32 %s1717_s10, 5  ;;  %s1109_s26 = sshll.u32 %s1717_s10, 3 }
   0xf   : > { %s339_s20 = scalar_lea.vmem %s1706_s0, %s1141_s17  ;;  %1445 = vmatpush3.bf16.msra.mxu0 %v1210_v2  ;;  %s343_s29 = scalar_lea.vmem %s1713_s7, %s1109_s26 }
  0x10   : > { %v1143_v3 = vld [vmem:[%s339_s20] sm:$0xff]   ;;  %1447 = vmatprep.subr.bf16.mxu0 %v1211_v5  ;;  %v1206_v6 = vld [vmem:[%s339_s20 + $0x8] sm:$0xff]   ;;  %v1207_v10 = vld [vmem:[%s339_s20 + $0x10] sm:$0xff]   ;;  %s1110_s11 = sshll.u32 %s1717_s10, 2  ;;  %s1111_s15 = sshll.u32 %s1717_s10, 1 }
  0x11   : > { %v1144_v4 = vunpack.c.l.bf16 %v1143_v3  ;;  %v1145_v8 = vunpack.c.h.bf16 %v1143_v3  ;;  %v1148_v9 = vunpack.c.l.bf16 %v1206_v6  ;;  %v1149_v12 = vunpack.c.h.bf16 %v1206_v6  ;;  %v1208_v14 = vld [vmem:[%s339_s20 + $0x18] sm:$0xff]   ;;  %s347_s14 = scalar_lea.vmem %s1714_s8, %s1110_s11  ;;  %s351_s18 = scalar_lea.vmem %s1715_s9, %s1111_s15 }
  0x12   : > { %v1152_v13 = vunpack.c.l.bf16 %v1207_v10  ;;  %v1153_v16 = vunpack.c.h.bf16 %v1207_v10  ;;  %v1156_v17 = vunpack.c.l.bf16 %v1208_v14  ;;  %v1157_v19 = vunpack.c.h.bf16 %v1208_v14 }
  0x13   : > { %1309 = vmatprep.mubr.msk.f32.mxu0 %vm386_vm0, %v1144_v4  ;;  %1449 = vmatpush3.bf16.msra.mxu0 %v1211_v5  ;;  %v790_v3 = vunpack.c.l.bf16 %v789_v0 }
  0x14   : > { %1463 = vmatprep.subr.bf16.mxu0 %v1175_v7 }
  0x16   : > { %1310 = vmatmul.mubr.msk.f32.vlgmr.msra.gmra.mrb[0].mxu0 %vm386_vm0, %v1145_v8 }
  0x17   : > { %1465 = vmatpush3.bf16.msra.mxu0 %v1175_v7  ;;  %1312 = vmatprep.mubr.msk.f32.mxu0 %vm386_vm0, %v1148_v9 }
  0x18   : > { %1467 = vmatprep.subr.bf16.mxu0 %v1212_v11 }
  0x1a   : > { %1313 = vmatmul.mubr.msk.f32.gmra.mrb[2].mxu0 %vm386_vm0, %v1149_v12 }
  0x1b   : > { %1469 = vmatpush3.bf16.msra.mxu0 %v1212_v11  ;;  %1315 = vmatprep.mubr.msk.f32.mxu0 %vm386_vm0, %v1152_v13 }
  0x1c   : > { %1471 = vmatprep.subr.bf16.mxu0 %v1213_v15 }
  0x1e   : > { %1316 = vmatmul.mubr.msk.f32.gmra.mrb[4].mxu0 %vm386_vm0, %v1153_v16 }
  0x1f   : > { %1473 = vmatpush3.bf16.msra.mxu0 %v1213_v15  ;;  %1318 = vmatprep.mubr.msk.f32.mxu0 %vm386_vm0, %v1156_v17 }
  0x20   : > { %1475 = vmatprep.subr.bf16.mxu0 %v1214_v18 }
  0x22   : > { %1319 = vmatmul.mubr.msk.f32.gmra.mrb[6].mxu0 %vm386_vm0, %v1157_v19 }
  0x23   : > { %1477 = vmatpush3.bf16.msra.mxu0 %v1214_v18  ;;  %1356 = vmatprep.mubr.msk.f32.mxu0 %vm386_vm0, %v1144_v4 }
  0x24   : > { %1491 = vmatprep.subr.bf16.mxu0 %v1191_v20 }
  0x26   : > { %1357 = vmatmul.mubr.msk.f32.vlgmr.msra.gmra.mrb[8].mxu0 %vm386_vm0, %v1145_v8 }
  0x27   : > { %1493 = vmatpush3.bf16.msra.mxu0 %v1191_v20  ;;  %1359 = vmatprep.mubr.msk.f32.mxu0 %vm386_vm0, %v1148_v9 }
  0x28   : > { %1495 = vmatprep.subr.bf16.mxu0 %v1215_v21 }
  0x2a   : > { %1360 = vmatmul.mubr.msk.f32.gmra.mrb[10].mxu0 %vm386_vm0, %v1149_v12 }
  0x2b   : > { %1497 = vmatpush3.bf16.msra.mxu0 %v1215_v21  ;;  %1362 = vmatprep.mubr.msk.f32.mxu0 %vm386_vm0, %v1152_v13 }
  0x2c   : > { %1499 = vmatprep.subr.bf16.mxu0 %v1216_v22 }
  0x2e   : > { %1363 = vmatmul.mubr.msk.f32.gmra.mrb[12].mxu0 %vm386_vm0, %v1153_v16 }
  0x2f   : > { %1501 = vmatpush3.bf16.msra.mxu0 %v1216_v22  ;;  %1365 = vmatprep.mubr.msk.f32.mxu0 %vm386_vm0, %v1156_v17 }
  0x30   : > { %1503 = vmatprep.subr.bf16.mxu0 %v1217_v23 }
  0x32   : > { %1366 = vmatmul.mubr.msk.f32.gmra.mrb[14].mxu0 %vm386_vm0, %v1157_v19 }
  0x33   : > { %1505 = vmatpush3.bf16.msra.mxu0 %v1217_v23  ;;  %1403 = vmatprep.mubr.msk.f32.mxu0 %vm386_vm0, %v1144_v4 }
  0x36   : > { %1404 = vmatmul.mubr.msk.f32.vlgmr.msra.gmra.mrb[16].mxu0 %vm386_vm0, %v1145_v8 }
  0x37   : > { %1406 = vmatprep.mubr.msk.f32.mxu0 %vm386_vm0, %v1148_v9 }
  0x3a   : > { %1407 = vmatmul.mubr.msk.f32.gmra.mrb[18].mxu0 %vm386_vm0, %v1149_v12 }
  0x3b   : > { %1409 = vmatprep.mubr.msk.f32.mxu0 %vm386_vm0, %v1152_v13 }
  0x3e   : > { %1410 = vmatmul.mubr.msk.f32.gmra.mrb[20].mxu0 %vm386_vm0, %v1153_v16 }
  0x3f   : > { %1412 = vmatprep.mubr.msk.f32.mxu0 %vm386_vm0, %v1156_v17 }
  0x42   : > { %1413 = vmatmul.mubr.msk.f32.gmra.mrb[22].mxu0 %vm386_vm0, %v1157_v19 }
  0xe9   : > { %v1311_v26 = vpop.f32.mrb[0].mxu0 }
  0xea   : > { %v477_v27 = vpop.f32.mrb[1].mxu0 }
  0xeb   : > { %v1451_v28 = vpack.c.bf16 %v1311_v26, %v477_v27 }
  0xed   : > { %v1314_v29 = vpop.f32.mrb[2].mxu0  ;;  %1452 = vmatpush3.bf16.msra.mxu1 %v1451_v28 }
  0xee   : > { %v487_v30 = vpop.f32.mrb[3].mxu0  ;;  %1453 = vmatprep.subr.bf16.mxu1 %v1537_v24 }
  0xef   : > { %v1454_v31 = vpack.c.bf16 %v1314_v29, %v487_v30 }
  0xf1   : > { %v1317_v32 = vpop.f32.mrb[4].mxu0  ;;  %1455 = vmatpush3.bf16.msra.mxu1 %v1454_v31 }
  0xf2   : > { %v497_v33 = vpop.f32.mrb[5].mxu0  ;;  %1456 = vmatprep.subr.bf16.mxu1 %v1537_v24 }
  0xf3   : > { %v1457_v34 = vpack.c.bf16 %v1317_v32, %v497_v33 }
  0xf5   : > { %v1320_v35 = vpop.f32.mrb[6].mxu0  ;;  %1458 = vmatpush3.bf16.msra.mxu1 %v1457_v34 }
  0xf6   : > { %v507_v37 = vpop.f32.mrb[7].mxu0  ;;  %1459 = vmatprep.subr.bf16.mxu1 %v1537_v24 }
  0xf7   : > { %v1460_v38 = vpack.c.bf16 %v1320_v35, %v507_v37 }
  0xf9   : > { %1461 = vmatpush3.bf16.msra.mxu1 %v1460_v38  ;;  %v1358_v40 = vpop.f32.mrb[8].mxu0 }
  0xfa   : > { %v675_v41 = vpop.f32.mrb[9].mxu0  ;;  %1478 = vmatprep.subr.bf16.mxu1 %v1537_v24 }
  0xfb   : > { %v1479_v42 = vpack.c.bf16 %v1358_v40, %v675_v41 }
  0xfc   : > { %1338 = vmatmul.mubr.msk.f32.vlgmr.msra.gmra.mrb[0].mxu1 %vm386_vm0, %v369_v39 }
  0xfd   : > { %v1361_v43 = vpop.f32.mrb[10].mxu0  ;;  %1480 = vmatpush3.bf16.msra.mxu1 %v1479_v42  ;;  %1384 = vmatprep.mubr.msk.f32.mxu1 %vm1538_vm1, %v1539_v25 }
  0xfe   : > { %v685_v44 = vpop.f32.mrb[11].mxu0  ;;  %1481 = vmatprep.subr.bf16.mxu1 %v1537_v24 }
  0xff   : > { %v1482_v45 = vpack.c.bf16 %v1361_v43, %v685_v44 }
 0x101   : > { %v1364_v46 = vpop.f32.mrb[12].mxu0  ;;  %1483 = vmatpush3.bf16.msra.mxu1 %v1482_v45 }
 0x102   : > { %v695_v47 = vpop.f32.mrb[13].mxu0  ;;  %1484 = vmatprep.subr.bf16.mxu1 %v1537_v24 }
 0x103   : > { %v1485_v48 = vpack.c.bf16 %v1364_v46, %v695_v47 }
 0x105   : > { %v1367_v49 = vpop.f32.mrb[14].mxu0  ;;  %1486 = vmatpush3.bf16.msra.mxu1 %v1485_v48 }
 0x106   : > { %v705_v51 = vpop.f32.mrb[15].mxu0  ;;  %1487 = vmatprep.subr.bf16.mxu1 %v1537_v24 }
 0x107   : > { %v1488_v52 = vpack.c.bf16 %v1367_v49, %v705_v51 }
 0x109   : > { %1489 = vmatpush3.bf16.msra.mxu1 %v1488_v52  ;;  %v1405_v54 = vpop.f32.mrb[16].mxu0 }
 0x10a   : > { %v873_v55 = vpop.f32.mrb[17].mxu0  ;;  %1506 = vmatprep.subr.bf16.mxu1 %v1537_v24 }
 0x10b   : > { %v1507_v56 = vpack.c.bf16 %v1405_v54, %v873_v55 }
 0x10c   : > { %1385 = vmatmul.mubr.msk.f32.vlgmr.msra.gmra.mrb[2].mxu1 %vm386_vm0, %v592_v53 }
 0x10d   : > { %v1408_v57 = vpop.f32.mrb[18].mxu0  ;;  %1508 = vmatpush3.bf16.msra.mxu1 %v1507_v56  ;;  %1431 = vmatprep.mubr.msk.f32.mxu1 %vm1538_vm1, %v1539_v25 }
 0x10e   : > { %v883_v58 = vpop.f32.mrb[19].mxu0  ;;  %1509 = vmatprep.subr.bf16.mxu1 %v1537_v24 }
 0x10f   : > { %v1510_v59 = vpack.c.bf16 %v1408_v57, %v883_v58 }
 0x111   : > { %v1411_v60 = vpop.f32.mrb[20].mxu0  ;;  %1511 = vmatpush3.bf16.msra.mxu1 %v1510_v59 }
 0x112   : > { %v893_v61 = vpop.f32.mrb[21].mxu0  ;;  %1512 = vmatprep.subr.bf16.mxu1 %v1537_v24 }
 0x113   : > { %v1513_v62 = vpack.c.bf16 %v1411_v60, %v893_v61 }
 0x115   : > { %v1414_v63 = vpop.f32.mrb[22].mxu0  ;;  %1514 = vmatpush3.bf16.msra.mxu1 %v1513_v62 }
 0x116   : > { %v903_v1 = vpop.f32.mrb[23].mxu0  ;;  %1515 = vmatprep.subr.bf16.mxu1 %v1537_v24 }
 0x117   : > { %v1516_v2 = vpack.c.bf16 %v1414_v63, %v903_v1 }
 0x119   : > { %1517 = vmatpush3.bf16.msra.mxu1 %v1516_v2 }
 0x11c   : > { %1432 = vmatmul.mubr.msk.f32.vlgmr.msra.gmra.mrb[4].mxu1 %vm386_vm0, %v790_v3 }
 0x1cf   : > { %v585_v4 = vpop.f32.mrb[0].mxu1 }
 0x1d0   : > { %590 = vst.msk [vmem:[%s343_s29] sm:$0xff] %vm589_vm2, %v585_v4  ;;  %v1339_v5 = vpop.f32.mrb[1].mxu1 }
 0x1df   : > { %v783_v6 = vpop.f32.mrb[2].mxu1 }
 0x1e0   : > { %788 = vst.msk [vmem:[%s347_s14] sm:$0xf] %vm787_vm3, %v783_v6  ;;  %v1386_v7 = vpop.f32.mrb[3].mxu1 }
 0x1ef   : > { %v981_v8 = vpop.f32.mrb[4].mxu1 }
 0x1f0   : > { %986 = vst.msk [vmem:[%s351_s18] sm:$0x3] %vm985_vm4, %v981_v8  ;;  %v1433_v9 = vpop.f32.mrb[5].mxu1 }
 0x1f1 PF: > { %s20_s30 = sadd.s32 1, %s1535_s30  }
 0x1f2   : > { %p17_p4 = scmp.ge.s32.totalorder %s20_s30, 4  }
 0x1f4   :  { %19 = sbr.rel (!%p17_p4) target bundleno = 1 (0x1), region = 102 }

</bundles_post_ra>
